<compile_context>
chip_gen: v5e
topology: v5e:2x2
jax: 0.10.0
libtpu: 0.0.40
codegen_flags: <defaults>
</compile_context>

<pallas_src>
import jax
import jax.numpy as jnp
from jax.experimental import pallas as pl
from jax.experimental.pallas import tpu as pltpu

_LANE = 128
_SUBLANE = 8


def _softplus_kernel(x_ref, o_ref):
    """Elementwise stable softplus-variant on one (tb, tl) tile."""
    x = x_ref[...].astype(jnp.float32)
    y = jnp.maximum(x, 0.0) + jnp.log(0.5 * jnp.exp(-jnp.abs(x)) + 0.5)
    o_ref[...] = y.astype(o_ref.dtype)


def _round_up(a, m):
    return -(-a // m) * m


def _as_2d(x):
    """Zero-copy 2-D view of x (row-major reshapes only; never pads)."""
    n = x.size
    for lanes in (1024, 512, 256, 128):        # lane-dense factorizations first
        if n % lanes == 0:
            return x.reshape(n // lanes, lanes)
    if x.ndim >= 2:                            # ragged total: keep HBM row layout
        return x.reshape(-1, x.shape[-1])
    return x.reshape(1, n)                     # 1-D ragged vector


def softplus_layer(x, *, target_block_bytes=2 * 1024 * 1024,
                   min_grid_steps=4, max_lane_block=8192):
    """Apply SoftplusLayer elementwise to an arbitrarily shaped tensor."""
    orig_shape = x.shape
    n = x.size
    if n == 0:
        return x

    x2d = _as_2d(x)
    rows, lanes = x2d.shape
    bpe = x2d.dtype.itemsize

    # ----- lane (last-dim) block: full dim if modest, else 128-aligned tiles -----
    tl = lanes if lanes <= max_lane_block else max_lane_block
    gl = pl.cdiv(lanes, tl)

    # ----- row (second-to-last-dim) block -----
    tl_vmem = _round_up(tl, _LANE)             # VMEM lane footprint per row
    rows_fit = max(_SUBLANE,
                   (target_block_bytes // (tl_vmem * bpe)) // _SUBLANE * _SUBLANE)
    if rows <= _SUBLANE:
        tb = rows                              # tiny input: one full-dim block
    else:
        # Guarantee >= min_grid_steps row blocks so double-buffering hides DMA
        # and v7x megacore can shard the parallel axis across both TensorCores.
        tb_split = max(_SUBLANE,
                       _round_up(pl.cdiv(rows, min_grid_steps), _SUBLANE))
        tb = min(rows_fit, tb_split)
    gr = pl.cdiv(rows, tb)                     # partial last block masked by Pallas

    cost = pl.CostEstimate(
        flops=6 * n,                           # abs/neg/mul/add/max/add
        transcendentals=2 * n,                 # exp + log
        bytes_accessed=2 * n * bpe,            # one read + one write of the tensor
    )

    out2d = pl.pallas_call(
        _softplus_kernel,
        out_shape=jax.ShapeDtypeStruct((rows, lanes), x.dtype),
        grid_spec=pltpu.PrefetchScalarGridSpec(
            num_scalar_prefetch=0,
            grid=(gr, gl),
            in_specs=[pl.BlockSpec((tb, tl), lambda i, j: (i, j))],
            out_specs=pl.BlockSpec((tb, tl), lambda i, j: (i, j)),
        ),
        compiler_params=pltpu.CompilerParams(
            dimension_semantics=("parallel", "parallel"),
        ),
        cost_estimate=cost,
    )(x2d)

    return out2d.reshape(orig_shape)           # free: same element count, no slice


softplus_layer_jit = jax.jit(
    softplus_layer,
    static_argnames=("target_block_bytes", "min_grid_steps", "max_lane_block"),
)


def softplus_reference(x):
    """Pure-JAX reference matching the PyTorch forward exactly."""
    return jnp.maximum(x, 0.0) + jnp.log(0.5 * jnp.exp(-jnp.abs(x)) + 0.5)


if __name__ == "__main__":
    key = jax.random.PRNGKey(0)
    k1, k2, k3 = jax.random.split(key, 3)

    # Small shape consistent with the module (elementwise over any tensor);
    # exercises the lane-dense factorization path (2048 % 1024 == 0).
    x_small = jax.random.normal(k1, (2, 4, 16, 16), jnp.float32) * 3.0
    out_small = jax.block_until_ready(softplus_layer_jit(x_small))
    ref_small = softplus_reference(x_small)
    assert out_small.shape == x_small.shape
    assert jnp.allclose(out_small, ref_small, atol=1e-5, rtol=1e-5), \
        "mismatch vs reference (small)"

    # Aligned mid-size shape: lane-dense (rows, 1024) view with a 4-step
    # pipelined / megacore-shardable grid.
    x_mid = jax.random.normal(k2, (512, 1024), jnp.float32) * 4.0
    out_mid = jax.block_until_ready(softplus_layer_jit(x_mid))
    ref_mid = softplus_reference(x_mid)
    assert out_mid.shape == x_mid.shape
    assert jnp.allclose(out_mid, ref_mid, atol=1e-5, rtol=1e-5), \
        "mismatch vs reference (mid)"

    # Ragged shape (total not divisible by 128): exercises the zero-copy
    # (rows, last_dim) view with partial-last-block masking — no pad, no slice.
    x_big = jax.random.normal(k3, (513, 777), jnp.float32) * 5.0
    out_big = jax.block_until_ready(softplus_layer_jit(x_big))
    ref_big = softplus_reference(x_big)
    assert out_big.shape == x_big.shape
    assert jnp.allclose(out_big, ref_big, atol=1e-5, rtol=1e-5), \
        "mismatch vs reference (big)"

    print("KERNEL_OK")
</pallas_src>

<mosaic_0001>
module attributes {stable_mosaic.version = 11 : i64} {
  func.func @_softplus_kernel(%arg0: i32, %arg1: i32, %arg2: memref<2x1024xf32, #tpu.memory_space<vmem>>, %arg3: memref<2x1024xf32, #tpu.memory_space<vmem>>) attributes {dimension_semantics = [#tpu.dimension_semantics<parallel>, #tpu.dimension_semantics<parallel>], iteration_bounds = array<i64: 1, 1>, scalar_prefetch = 0 : i64, scratch_operands = 0 : i64, tpu.core_type = #tpu.core_type<tc>, window_params = [{transform_indices = @transform_0, window_bounds = array<i64: 2, 1024>}, {transform_indices = @transform_1, window_bounds = array<i64: 2, 1024>}]} {
    %c0 = arith.constant 0 : index
    %c0_0 = arith.constant 0 : index
    %0 = vector.load %arg2[%c0, %c0_0] : memref<2x1024xf32, #tpu.memory_space<vmem>>, vector<2x1024xf32>
    %cst = arith.constant 0.000000e+00 : f32
    %1 = vector.broadcast %cst : f32 to vector<2x1024xf32>
    %2 = arith.maximumf %0, %1 : vector<2x1024xf32>
    %3 = math.absf %0 : vector<2x1024xf32>
    %cst_1 = arith.constant 0.000000e+00 : f32
    %4 = vector.broadcast %cst_1 : f32 to vector<2x1024xf32>
    %5 = arith.subf %4, %3 : vector<2x1024xf32>
    %6 = math.exp %5 : vector<2x1024xf32>
    %cst_2 = arith.constant 5.000000e-01 : f32
    %7 = vector.broadcast %cst_2 : f32 to vector<2x1024xf32>
    %8 = arith.mulf %7, %6 : vector<2x1024xf32>
    %cst_3 = arith.constant 5.000000e-01 : f32
    %9 = vector.broadcast %cst_3 : f32 to vector<2x1024xf32>
    %10 = arith.addf %8, %9 : vector<2x1024xf32>
    %11 = math.log %10 : vector<2x1024xf32>
    %12 = arith.addf %2, %11 : vector<2x1024xf32>
    %c0_4 = arith.constant 0 : index
    %c0_5 = arith.constant 0 : index
    %13 = vector.load %arg3[%c0_4, %c0_5] : memref<2x1024xf32, #tpu.memory_space<vmem>>, vector<2x1024xf32>
    tpu.vector_store %arg3[%c0_4, %c0_5], %12 {strides = array<i32>} : memref<2x1024xf32, #tpu.memory_space<vmem>>, vector<2x1024xf32>,
    return
  }
  func.func @transform_0(%arg0: i32, %arg1: i32) -> (i32, i32) {
    %c0_i32 = arith.constant 0 : i32
    return %arg0, %arg1 : i32, i32
  }
  func.func @transform_1(%arg0: i32, %arg1: i32) -> (i32, i32) {
    %c0_i32 = arith.constant 0 : i32
    return %arg0, %arg1 : i32, i32
  }
}

</mosaic_0001>

<bundles_post_ra>
// kernel: softplus_layer.1
= control target key start
LH: loop header
LB: loop body
LE: loop exit
PB: predicated region body
PF: predicated region fallthrough
CT: control target
= control target key end

     0   :  { %s66_s0 = inlined_call_operand.vmem [shape: f32[2,1024], index: 0, kind: input, shape index: {}]   ;;  %s67_s1 = inlined_call_operand.vmem [shape: f32[2,1024], index: 1, kind: output, shape index: {}]  }
   0x1   :  { %v8_v0 = vld [vmem:[%s66_s0] sm:$0xff]  ;;  %v9_v1 = vld [vmem:[%s66_s0 + $0x8] sm:$0xff] }
   0x2   :  { %v12_v2 = vand.u32 2147483647, %v8_v0  ;;  %v13_v3 = vand.u32 2147483647, %v9_v1  ;;  %v10_v14 = vmax.f32 %v8_v0, 0.0  ;;  %v11_v16 = vmax.f32 %v9_v1, 0.0 }
   0x4   :  { %v14_v4 = vsub.f32 0.0, %v12_v2  ;;  %v15_v5 = vsub.f32 0.0, %v13_v3 }
   0x6   :  { %v16_v6 = vmul.f32 1.442695, %v14_v4  ;;  %v18_v7 = vmul.f32 1.442695, %v15_v5 }
   0x8   :  { %36 = vpow2.f32 %v16_v6 }
   0x9   :  { %38 = vpow2.f32 %v18_v7 }
   0xe   :  { %v37_v8 = vpop.eup %36 }
   0xf   :  { %v39_v9 = vpop.eup %38  ;;  %v20_v10 = vmul.f32 0.5, %v37_v8 }
  0x10   :  { %v21_v11 = vmul.f32 0.5, %v39_v9 }
  0x11   :  { %v22_v12 = vadd.f32 0.5, %v20_v10 }
  0x12   :  { %v23_v13 = vadd.f32 0.5, %v21_v11 }
  0x13   :  { %40 = vlog2.f32 %v22_v12 }
  0x14   :  { %42 = vlog2.f32 %v23_v13 }
  0x19   :  { %v41_v15 = vpop.eup %40 }
  0x1a   :  { %v43_v17 = vpop.eup %42  ;;  %v25_v18 = vmul.f32 0.6931472, %v41_v15 }
  0x1b   :  { %v27_v19 = vmul.f32 0.6931472, %v43_v17 }
  0x1c   :  { %v28_v20 = vadd.f32 %v25_v18, %v10_v14 }
  0x1d   :  { %v29_v21 = vadd.f32 %v27_v19, %v11_v16 }
  0x1e   :  { %30 = vst [vmem:[%s67_s1] sm:$0xff] %v28_v20 }
  0x1f   :  { %31 = vst [vmem:[%s67_s1 + $0x8] sm:$0xff] %v29_v21 }

</bundles_post_ra>
